<compile_context>
chip_gen: v6e
topology: v6e:2x2x1
jax: 0.10.0
libtpu: 0.0.40
codegen_flags: <defaults>
</compile_context>

<pallas_src>
import functools

import jax
import jax.numpy as jnp
from jax import lax
from jax.experimental import pallas as pl
from jax.experimental.pallas import tpu as pltpu


def _stats_pool_partial_kernel(x_ref, sum_ref, sq_ref, shift_ref, *,
                               tt, kt, valid_rows, masked):
    """Streams one (tb, tt, Dl) time tile into shifted sum / sum-of-squares."""
    p = pl.program_id(0)          # reduction split (parallel)
    k = pl.program_id(2)          # time tile within split (arbitrary, last)

    @pl.when(k == 0)
    def _init():
        # Per-(row, lane) shift = first valid element of this split. Removes
        # the bulk of the mean before squaring, guarding against catastrophic
        # cancellation in the one-pass variance formulation.
        shift_ref[0] = x_ref[:, 0, :].astype(jnp.float32)
        sum_ref[...] = jnp.zeros_like(sum_ref)
        sq_ref[...] = jnp.zeros_like(sq_ref)

    x = x_ref[...].astype(jnp.float32)               # (tb, tt, Dl), f32 accum path
    y = x - shift_ref[0][:, None, :]
    if masked:
        # Ragged last tile / over-split duplicate tiles: zero rows past the
        # valid length (where is a select, so OOB garbage never propagates).
        rem = valid_rows - (p * kt + k) * tt
        row = lax.broadcasted_iota(jnp.int32, (1, tt, 1), 1)
        y = jnp.where(row < rem, y, 0.0)
    sum_ref[0] += jnp.sum(y, axis=1)                 # (tb, Dl)
    sq_ref[0] += jnp.sum(y * y, axis=1)              # (tb, Dl)


def _vmem_capacity_bytes():
    try:
        return int(pltpu.get_tpu_info().vmem_capacity_bytes)
    except Exception:
        return 64 * 1024 * 1024   # conservative (v7x-sized) fallback


def stats_pool(x, floor=1e-10, bessel=False, *, max_tile_bytes=None):
    """Pallas TPU StatsPool.forward. x: (B, T, D) -> (B, 2*D) = [mean ; std]."""
    B, T, D = x.shape
    orig_dtype = x.dtype
    itemsize = jnp.dtype(x.dtype).itemsize

    # --- per-generation tile / VMEM budget ---------------------------------
    vmem_cap = _vmem_capacity_bytes()
    if vmem_cap >= 100 * 1024 * 1024:         # v5e / v6e: 128 MiB VMEM
        default_tile = 8 * 1024 * 1024
        vmem_limit = 64 * 1024 * 1024
    else:                                      # v7x: 64 MiB VMEM -> keep headroom
        default_tile = 4 * 1024 * 1024
        vmem_limit = 48 * 1024 * 1024
    if max_tile_bytes is None:
        max_tile_bytes = default_tile

    # --- lane-dense layout: fold time into lanes for small D ----------------
    if D % 128 == 0:
        f = 1                                  # already lane-dense
    elif D < 128 and 128 % D == 0 and T % (128 // D) == 0:
        f = 128 // D                           # fold f time steps into lanes
    else:
        # TODO(synk): D neither multiple nor divisor of 128 (or ragged fold):
        # fall back to D lanes (correct, vregs partially padded).
        f = 1
    dl = f * D
    tf = T // f                                # folded time length
    xk = x if f == 1 else x.reshape(B, tf, dl)  # contiguous merge -> free reshape

    # --- batch tile ----------------------------------------------------------
    tb = 8 if B % 8 == 0 else B                # 8-sublane aligned or full dim
    n_b_blocks = B // tb

    # --- time tile: sublane-packing aligned, sized to the VMEM budget --------
    row_align = max(8, 32 // itemsize)         # 8 f32 / 16 bf16 / 32 int8-fp8
    fit_rows = max(1, max_tile_bytes // max(1, tb * dl * itemsize))
    if fit_rows >= tf:
        tt = tf                                # whole (folded) time axis: full dim
    else:
        tt = max(row_align, (fit_rows // row_align) * row_align)
    nb = pl.cdiv(tf, tt)                       # number of time blocks

    # --- 2-way reduction split so the parallel grid has >=2 blocks (v7x) -----
    p_splits = 1 if (n_b_blocks >= 2 or nb < 2) else 2
    kt = pl.cdiv(nb, p_splits)                 # time blocks per split
    masked = (p_splits * kt * tt) != tf        # any ragged / duplicated block?

    kernel = functools.partial(
        _stats_pool_partial_kernel, tt=tt, kt=kt, valid_rows=tf, masked=masked)

    acc_shape = jax.ShapeDtypeStruct((p_splits, B, dl), jnp.float32)
    out_spec = pl.BlockSpec((1, tb, dl), lambda p, b, k: (p, b, 0))
    psum, psq, pshift = pl.pallas_call(
        kernel,
        out_shape=(acc_shape, acc_shape, acc_shape),
        grid_spec=pltpu.PrefetchScalarGridSpec(
            num_scalar_prefetch=0,
            grid=(p_splits, n_b_blocks, kt),
            in_specs=[pl.BlockSpec(
                (tb, tt, dl),
                lambda p, b, k: (b, jnp.minimum(p * kt + k, nb - 1), 0))],
            out_specs=[out_spec, out_spec, out_spec],
        ),
        compiler_params=pltpu.CompilerParams(
            dimension_semantics=("parallel", "parallel", "arbitrary"),
            vmem_limit_bytes=vmem_limit,
        ),
    )(xk)

    # --- tiny combine / finalize in the wrapper (exact algebra) --------------
    t_stat = max(T - 1 if bessel else T, 1)
    counts = jnp.asarray(
        [max(0, min(tf - p * kt * tt, kt * tt)) for p in range(p_splits)],
        dtype=jnp.float32).reshape(p_splits, 1, 1, 1)

    psum = psum.reshape(p_splits, B, f, D)
    psq = psq.reshape(p_splits, B, f, D)
    pshift = pshift.reshape(p_splits, B, f, D)

    total = jnp.sum(psum + counts * pshift, axis=(0, 2))       # exact sum(x): (B, D)
    means = total * (1.0 / T)
    c = means[None, :, None, :] - pshift                       # (P, B, f, D)
    #   sum((x-mean)^2) = sum_y2 - 2*c*sum_y + n*c^2, summed over splits/groups
    numer = jnp.sum(psq + c * (counts * c - 2.0 * psum), axis=(0, 2))
    stds = jnp.sqrt(jnp.maximum(numer, floor) / t_stat)
    return jnp.concatenate([means, stds], axis=1).astype(orig_dtype)


def _stats_pool_ref(x, floor=1e-10, bessel=False):
    # Pure-JAX reference mirroring the PyTorch module, for verification.
    means = jnp.mean(x, axis=1)
    t = x.shape[1] - 1 if bessel else x.shape[1]
    residuals = x - means[:, None, :]
    numerator = jnp.sum(residuals ** 2, axis=1)
    stds = jnp.sqrt(jnp.maximum(numerator, floor) / t)
    return jnp.concatenate([means, stds], axis=1)


if __name__ == "__main__":
    key = jax.random.PRNGKey(0)

    # Primary check: small shapes consistent with the module (B=2, T=8, D=32).
    x = jax.random.normal(key, (2, 8, 32), dtype=jnp.float32)
    out = jax.block_until_ready(stats_pool(x, floor=1e-10, bessel=False))
    ref = _stats_pool_ref(x, floor=1e-10, bessel=False)
    assert out.shape == (2, 64), out.shape
    assert jnp.allclose(out, ref, atol=1e-5, rtol=1e-5), "mismatch (primary)"

    # Exercise ragged-T masking, the 2-way reduction split and bessel=True
    # (small max_tile_bytes forces multiple time tiles).
    x2 = 10.0 + 0.5 * jax.random.normal(jax.random.PRNGKey(1), (2, 72, 32),
                                        dtype=jnp.float32)
    out2 = jax.block_until_ready(
        stats_pool(x2, floor=1e-10, bessel=True, max_tile_bytes=8 * 1024))
    ref2 = _stats_pool_ref(x2, floor=1e-10, bessel=True)
    assert jnp.allclose(out2, ref2, atol=1e-4, rtol=1e-4), "mismatch (ragged/split)"

    # Exercise the no-fold fallback (D not a divisor of 128).
    x3 = jax.random.normal(jax.random.PRNGKey(2), (2, 8, 48), dtype=jnp.float32)
    out3 = jax.block_until_ready(stats_pool(x3))
    ref3 = _stats_pool_ref(x3)
    assert jnp.allclose(out3, ref3, atol=1e-5, rtol=1e-5), "mismatch (no-fold)"

    print("KERNEL_OK")
</pallas_src>

<mosaic_0001>
module attributes {stable_mosaic.version = 11 : i64} {
  func.func @_stats_pool_partial_kernel(%arg0: i32, %arg1: i32, %arg2: i32, %arg3: memref<2x2x128xf32, #tpu.memory_space<vmem>>, %arg4: memref<1x2x128xf32, #tpu.memory_space<vmem>>, %arg5: memref<1x2x128xf32, #tpu.memory_space<vmem>>, %arg6: memref<1x2x128xf32, #tpu.memory_space<vmem>>) attributes {dimension_semantics = [#tpu.dimension_semantics<parallel>, #tpu.dimension_semantics<parallel>, #tpu.dimension_semantics<arbitrary>], iteration_bounds = array<i64: 1, 1, 1>, scalar_prefetch = 0 : i64, scratch_operands = 0 : i64, tpu.core_type = #tpu.core_type<tc>, window_params = [{transform_indices = @transform_0, window_bounds = array<i64: 2, 2, 128>}, {transform_indices = @transform_1, window_bounds = array<i64: 1, 2, 128>}, {transform_indices = @transform_2, window_bounds = array<i64: 1, 2, 128>}, {transform_indices = @transform_3, window_bounds = array<i64: 1, 2, 128>}]} {
    %c0_i32 = arith.constant 0 : i32
    %0 = arith.cmpi eq, %arg2, %c0_i32 : i32
    %1 = arith.extui %0 : i1 to i32
    %c0_i32_0 = arith.constant 0 : i32
    %2 = arith.cmpi ne, %1, %c0_i32_0 : i32
    scf.if %2 {
      %c0_19 = arith.constant 0 : index
      %c0_20 = arith.constant 0 : index
      %c0_21 = arith.constant 0 : index
      %24 = vector.load %arg3[%c0_19, %c0_20, %c0_21] : memref<2x2x128xf32, #tpu.memory_space<vmem>>, vector<2x1x128xf32>
      %25 = vector.shape_cast %24 : vector<2x1x128xf32> to vector<2x128xf32>
      %c0_22 = arith.constant 0 : index
      %c0_23 = arith.constant 0 : index
      %c0_24 = arith.constant 0 : index
      %26 = vector.load %arg6[%c0_22, %c0_23, %c0_24] : memref<1x2x128xf32, #tpu.memory_space<vmem>>, vector<1x2x128xf32>
      %27 = vector.shape_cast %26 : vector<1x2x128xf32> to vector<2x128xf32>
      %28 = vector.shape_cast %25 : vector<2x128xf32> to vector<1x2x128xf32>
      tpu.vector_store %arg6[%c0_22, %c0_23, %c0_24], %28 {strides = array<i32>} : memref<1x2x128xf32, #tpu.memory_space<vmem>>, vector<1x2x128xf32>,
      %cst_25 = arith.constant 0.000000e+00 : f32
      %29 = vector.broadcast %cst_25 : f32 to vector<1x2x128xf32>
      %c0_26 = arith.constant 0 : index
      %c0_27 = arith.constant 0 : index
      %c0_28 = arith.constant 0 : index
      %30 = vector.load %arg4[%c0_26, %c0_27, %c0_28] : memref<1x2x128xf32, #tpu.memory_space<vmem>>, vector<1x2x128xf32>
      tpu.vector_store %arg4[%c0_26, %c0_27, %c0_28], %29 {strides = array<i32>} : memref<1x2x128xf32, #tpu.memory_space<vmem>>, vector<1x2x128xf32>,
      %cst_29 = arith.constant 0.000000e+00 : f32
      %31 = vector.broadcast %cst_29 : f32 to vector<1x2x128xf32>
      %c0_30 = arith.constant 0 : index
      %c0_31 = arith.constant 0 : index
      %c0_32 = arith.constant 0 : index
      %32 = vector.load %arg5[%c0_30, %c0_31, %c0_32] : memref<1x2x128xf32, #tpu.memory_space<vmem>>, vector<1x2x128xf32>
      tpu.vector_store %arg5[%c0_30, %c0_31, %c0_32], %31 {strides = array<i32>} : memref<1x2x128xf32, #tpu.memory_space<vmem>>, vector<1x2x128xf32>,
    } else {
    }
    %c0 = arith.constant 0 : index
    %c0_1 = arith.constant 0 : index
    %c0_2 = arith.constant 0 : index
    %3 = vector.load %arg3[%c0, %c0_1, %c0_2] : memref<2x2x128xf32, #tpu.memory_space<vmem>>, vector<2x2x128xf32>
    %c0_3 = arith.constant 0 : index
    %c0_4 = arith.constant 0 : index
    %c0_5 = arith.constant 0 : index
    %4 = vector.load %arg6[%c0_3, %c0_4, %c0_5] : memref<1x2x128xf32, #tpu.memory_space<vmem>>, vector<1x2x128xf32>
    %5 = vector.shape_cast %4 : vector<1x2x128xf32> to vector<2x128xf32>
    %6 = vector.shape_cast %5 : vector<2x128xf32> to vector<2x1x128xf32>
    %7 = vector.broadcast %6 : vector<2x1x128xf32> to vector<2x2x128xf32>
    %8 = arith.subf %3, %7 : vector<2x2x128xf32>
    %c0_6 = arith.constant 0 : index
    %c0_7 = arith.constant 0 : index
    %c0_8 = arith.constant 0 : index
    %9 = vector.load %arg4[%c0_6, %c0_7, %c0_8] : memref<1x2x128xf32, #tpu.memory_space<vmem>>, vector<1x2x128xf32>
    %10 = vector.shape_cast %9 : vector<1x2x128xf32> to vector<2x128xf32>
    %cst = arith.constant dense<0.000000e+00> : vector<2x128xf32>
    %11 = vector.multi_reduction <add>, %8, %cst [1] : vector<2x2x128xf32> to vector<2x128xf32>
    %12 = arith.addf %10, %11 : vector<2x128xf32>
    %c0_9 = arith.constant 0 : index
    %c0_10 = arith.constant 0 : index
    %c0_11 = arith.constant 0 : index
    %13 = vector.load %arg4[%c0_9, %c0_10, %c0_11] : memref<1x2x128xf32, #tpu.memory_space<vmem>>, vector<1x2x128xf32>
    %14 = vector.shape_cast %13 : vector<1x2x128xf32> to vector<2x128xf32>
    %15 = vector.shape_cast %12 : vector<2x128xf32> to vector<1x2x128xf32>
    tpu.vector_store %arg4[%c0_9, %c0_10, %c0_11], %15 {strides = array<i32>} : memref<1x2x128xf32, #tpu.memory_space<vmem>>, vector<1x2x128xf32>,
    %c0_12 = arith.constant 0 : index
    %c0_13 = arith.constant 0 : index
    %c0_14 = arith.constant 0 : index
    %16 = vector.load %arg5[%c0_12, %c0_13, %c0_14] : memref<1x2x128xf32, #tpu.memory_space<vmem>>, vector<1x2x128xf32>
    %17 = vector.shape_cast %16 : vector<1x2x128xf32> to vector<2x128xf32>
    %18 = arith.mulf %8, %8 : vector<2x2x128xf32>
    %cst_15 = arith.constant dense<0.000000e+00> : vector<2x128xf32>
    %19 = vector.multi_reduction <add>, %18, %cst_15 [1] : vector<2x2x128xf32> to vector<2x128xf32>
    %20 = arith.addf %17, %19 : vector<2x128xf32>
    %c0_16 = arith.constant 0 : index
    %c0_17 = arith.constant 0 : index
    %c0_18 = arith.constant 0 : index
    %21 = vector.load %arg5[%c0_16, %c0_17, %c0_18] : memref<1x2x128xf32, #tpu.memory_space<vmem>>, vector<1x2x128xf32>
    %22 = vector.shape_cast %21 : vector<1x2x128xf32> to vector<2x128xf32>
    %23 = vector.shape_cast %20 : vector<2x128xf32> to vector<1x2x128xf32>
    tpu.vector_store %arg5[%c0_16, %c0_17, %c0_18], %23 {strides = array<i32>} : memref<1x2x128xf32, #tpu.memory_space<vmem>>, vector<1x2x128xf32>,
    return
  }
  func.func @transform_0(%arg0: i32, %arg1: i32, %arg2: i32) -> (i32, i32, i32) {
    %c1_i32 = arith.constant 1 : i32
    %0 = arith.muli %arg0, %c1_i32 : i32
    %1 = arith.addi %0, %arg2 : i32
    %c0_i32 = arith.constant 0 : i32
    %2 = arith.minsi %1, %c0_i32 : i32
    %c0_i32_0 = arith.constant 0 : i32
    %c0_i32_1 = arith.constant 0 : i32
    return %arg1, %2, %c0_i32_0 : i32, i32, i32
  }
  func.func @transform_1(%arg0: i32, %arg1: i32, %arg2: i32) -> (i32, i32, i32) {
    %c0_i32 = arith.constant 0 : i32
    %c0_i32_0 = arith.constant 0 : i32
    return %arg0, %arg1, %c0_i32 : i32, i32, i32
  }
  func.func @transform_2(%arg0: i32, %arg1: i32, %arg2: i32) -> (i32, i32, i32) {
    %c0_i32 = arith.constant 0 : i32
    %c0_i32_0 = arith.constant 0 : i32
    return %arg0, %arg1, %c0_i32 : i32, i32, i32
  }
  func.func @transform_3(%arg0: i32, %arg1: i32, %arg2: i32) -> (i32, i32, i32) {
    %c0_i32 = arith.constant 0 : i32
    %c0_i32_0 = arith.constant 0 : i32
    return %arg0, %arg1, %c0_i32 : i32, i32, i32
  }
}

</mosaic_0001>

<bundles_post_ra>
// kernel: tpu_custom_call.1
= control target key start
LH: loop header
LB: loop body
LE: loop exit
PB: predicated region body
PF: predicated region fallthrough
CT: control target
= control target key end

     0   :  { %9 = vsyncpa [#allocation3], 0  ;;  %s316_s0 = inlined_call_operand.hbm [shape: f32[2,2,128], index: 0, kind: input, shape index: {}]   ;;  %s317_s1 = inlined_call_operand.hbm [shape: f32[1,2,128], index: 1, kind: output, shape index: {0}]   ;;  %s318_s2 = inlined_call_operand.hbm [shape: f32[1,2,128], index: 2, kind: output, shape index: {1}]   ;;  %s319_s3 = inlined_call_operand.hbm [shape: f32[1,2,128], index: 3, kind: output, shape index: {2}]  }
   0x1   :  { %10 = vsyncpa [#allocation4], 0 }
   0x2   :  { %11 = vsyncpa [#allocation7], 0  ;;  %s273_s12 = smov [#allocation2]  }
   0x3   :  { %s22_s13 = sshll.u32 %s273_s12, 4  ;;  %s23_s13 = int_to_ptr.vmem [resolvable:$true] %s22_s13 }
   0x4   :  { %s195_s14 = scalar_lea.vmem %s23_s13, 64  ;;  %p200_p1 = scmp.lt.s32.totalorder %s23_s13, %s23_s13 }
   0x5   :  { %p196_p0 = scmp.ne.s32.totalorder %s23_s13, %s195_s14  ;;  %p201_p2 = scmp.lt.s32.totalorder %s195_s14, %s195_s14 }
   0x7   :  { %p202_p3 = por %p201_p2, %p200_p1 }
   0x9   :  { %p203_p4 = pnand %p202_p3, %p196_p0 }
   0xb   :  { %206 = shalt.err (!%p203_p4)
}
   0xc   :  { %s274_s15 = smov 32   ;;  %s275_s16 = smov 2  }
   0xd   :  { %28 = dma.hbm_to_vmem [thread:$0]  %s316_s0, 64, %s23_s13, [#allocation3], %s274_s15, %s274_s15, %s275_s16  }
   0xe   :  { %267 = dma.done.wait [#allocation3], 64  }
   0xf   :  { %268 = vsyncadd [#allocation3], 4294967232  ;;  %v276_v0 = vmov 0.0   ;;  %v39_v1 = vld [vmem:[#allocation2] sm:$0x1]  ;;  %vm44_vm0 = vcmask 1041409   ;;  %v65_v5 = vlaneseq }
  0x10   :  { %48 = vst [vmem:[#allocation5] sm:$0x3] %v276_v0  ;;  %49 = vst [vmem:[#allocation6] sm:$0x3] %v276_v0  ;;  %v40_v2 = vld [vmem:[#allocation2 + $0x2] sm:$0x1] }
  0x11   :  { %v277_v3 = vmov 1966171168   ;;  %v43_v6 = vrot.slane %v40_v2, 7  ;;  %v66_v9 = vshrl.u32 %v65_v5, 7  ;;  %v50_v15 = vld [vmem:[#allocation2] sm:$0x3] }
  0x12   :  { %v63_v4 = vunpack.c.l.s4 %v277_v3  ;;  %v51_v18 = vld [vmem:[#allocation2 + $0x2] sm:$0x3]  ;;  %vm89_vm1 = vcmask 1041408   ;;  %s278_s0 = smov [#allocation5]   ;;  %s279_s20 = smov [#allocation6]  }
  0x13   :  { %v45_v7 = vsel %vm44_vm0, %v43_v6, %v39_v1  ;;  %v78_v11 = vsub.s32 0, %v66_v9  ;;  %s140_s19 = sshll.u32 %s278_s0, 4  ;;  %s150_s21 = sshll.u32 %s279_s20, 4  ;;  %s141_s19 = int_to_ptr.vmem [resolvable:$true] %s140_s19  ;;  %s151_s21 = int_to_ptr.vmem [resolvable:$true] %s150_s21 }
  0x14   :  { %47 = vst [vmem:[#allocation8] sm:$0x3] %v45_v7  ;;  %v64_v8 = vunpack.c.0.s8 %v63_v4  ;;  %s280_s22 = smov [#allocation8]   ;;  %s207_s24 = scalar_lea.vmem %s141_s19, 32 }
  0x15   :  { %s160_s23 = sshll.u32 %s280_s22, 4  ;;  %p208_p5 = scmp.ne.s32.totalorder %s141_s19, %s207_s24  ;;  %s161_s23 = int_to_ptr.vmem [resolvable:$true] %s160_s23 }
  0x16   :  { %v67_v10 = vsub.s32 %v64_v8, %v66_v9  ;;  %p212_p6 = scmp.lt.s32.totalorder %s141_s19, %s141_s19  ;;  %p213_p7 = scmp.lt.s32.totalorder %s207_s24, %s207_s24 }
  0x17   :  { %v88_v50 = vld [vmem:[#allocation5] sm:$0x3]  ;;  %v111_v54 = vld [vmem:[#allocation6] sm:$0x3] }
  0x18   :  { %p214_p8 = por %p213_p7, %p212_p6 }
  0x1a   :  { %p215_p9 = pnand %p214_p8, %p208_p5 }
  0x1b   :  { %v178_v12 = vld.sshfl [vmem:[#allocation8] sm:$0x11 pattern:$0x75316420] }
  0x1c   :  { %v61_v13 = vcombine.high %v178_v12, %v178_v12  ;;  %v68_v14 = vrot.slane %v178_v12, %v67_v10 }
  0x1e   :  { %v75_v16 = vrot.slane %v61_v13, %v67_v10  ;;  %v79_v17 = vrot.slane %v68_v14, %v78_v11 }
  0x20   :  { %v83_v19 = vrot.slane %v75_v16, %v78_v11  ;;  %v86_v20 = vsub.f32 %v50_v15, %v79_v17 }
  0x22   :  { %v87_v21 = vsub.f32 %v51_v18, %v83_v19  ;;  %v90_v22 = vsel %vm89_vm1, %v86_v20, 0.0  ;;  %v112_v23 = vmul.f32 %v86_v20, %v86_v20 }
  0x23   :  { %v91_v24 = vrot.slane %v90_v22, 4 }
  0x24   :  { %v97_v25 = vsel %vm89_vm1, %v87_v21, 0.0  ;;  %v113_v26 = vmul.f32 %v87_v21, %v87_v21  ;;  %v114_v27 = vsel %vm89_vm1, %v112_v23, 0.0 }
  0x25   :  { %v92_v28 = vadd.f32 %v91_v24, %v90_v22  ;;  %v98_v29 = vrot.slane %v97_v25, 4  ;;  %v115_v30 = vrot.slane %v114_v27, 4 }
  0x26   :  { %v121_v31 = vsel %vm89_vm1, %v113_v26, 0.0 }
  0x27   :  { %v93_v32 = vrot.slane %v92_v28, 2  ;;  %v99_v33 = vadd.f32 %v98_v29, %v97_v25  ;;  %v116_v34 = vadd.f32 %v115_v30, %v114_v27  ;;  %v122_v35 = vrot.slane %v121_v31, 4 }
  0x29   :  { %v94_v36 = vadd.f32 %v93_v32, %v92_v28  ;;  %v100_v37 = vrot.slane %v99_v33, 2  ;;  %v117_v38 = vrot.slane %v116_v34, 2  ;;  %v123_v39 = vadd.f32 %v122_v35, %v121_v31 }
  0x2b   :  { %v95_v40 = vrot.slane %v94_v36, 1  ;;  %v101_v41 = vadd.f32 %v100_v37, %v99_v33  ;;  %v118_v42 = vadd.f32 %v117_v38, %v116_v34  ;;  %v124_v43 = vrot.slane %v123_v39, 2 }
  0x2d   :  { %v102_v44 = vrot.slane %v101_v41, 1  ;;  %v119_v45 = vrot.slane %v118_v42, 1  ;;  %v125_v46 = vadd.f32 %v124_v43, %v123_v39  ;;  %v96_v47 = vadd.f32 %v95_v40, %v94_v36 }
  0x2f   :  { %v103_v48 = vadd.f32 %v102_v44, %v101_v41  ;;  %v126_v49 = vrot.slane %v125_v46, 1  ;;  %v120_v52 = vadd.f32 %v119_v45, %v118_v42 }
  0x31   :  { %v107_v51 = vsel %vm44_vm0, %v103_v48, %v96_v47  ;;  %v127_v53 = vadd.f32 %v126_v49, %v125_v46 }
  0x32   :  { %v109_v55 = vadd.f32 %v107_v51, %v88_v50 }
  0x33   :  { %v130_v56 = vsel %vm44_vm0, %v127_v53, %v120_v52 }
  0x34   :  { %110 = vst [vmem:[#allocation5] sm:$0x3] %v109_v55  ;;  %v132_v57 = vadd.f32 %v130_v56, %v111_v54 }
  0x35   :  { %218 = shalt.err (!%p215_p9)
}
  0x36   :  { %143 = dma.vmem_to_hbm [thread:$0]  %s141_s19, 32, %s317_s1, [#allocation4]   ;;  %133 = vst [vmem:[#allocation6] sm:$0x3] %v132_v57 }
  0x37   :  { %s227_s27 = scalar_lea.vmem %s151_s21, 32  ;;  %p232_p11 = scmp.lt.s32.totalorder %s151_s21, %s151_s21 }
  0x38   :  { %p228_p10 = scmp.ne.s32.totalorder %s151_s21, %s227_s27  ;;  %p233_p12 = scmp.lt.s32.totalorder %s227_s27, %s227_s27 }
  0x3a   :  { %p234_p13 = por %p233_p12, %p232_p11 }
  0x3c   :  { %p235_p0 = pnand %p234_p13, %p228_p10 }
  0x3e   :  { %238 = shalt.err (!%p235_p0)
}
  0x3f   :  { %153 = dma.vmem_to_hbm [thread:$0]  %s151_s21, 32, %s318_s2, [#allocation7]  }
  0x40   :  { %s247_s30 = scalar_lea.vmem %s161_s23, 32  ;;  %p252_p2 = scmp.lt.s32.totalorder %s161_s23, %s161_s23 }
  0x41   :  { %p248_p1 = scmp.ne.s32.totalorder %s161_s23, %s247_s30  ;;  %p253_p3 = scmp.lt.s32.totalorder %s247_s30, %s247_s30 }
  0x43   :  { %p254_p4 = por %p253_p3, %p252_p2 }
  0x45   :  { %p255_p5 = pnand %p254_p4, %p248_p1 }
  0x47   :  { %258 = shalt.err (!%p255_p5)
}
  0x48   :  { %163 = dma.vmem_to_hbm [thread:$0]  %s161_s23, 32, %s319_s3, [#allocation7]  }
  0x49   :  { %269 = dma.done.wait [#allocation4], 32  }
  0x4a   :  { %270 = vsyncadd [#allocation4], 4294967264 }
  0x4b   :  { %271 = dma.done.wait [#allocation7], 64  }
  0x4c   :  { %272 = vsyncadd [#allocation7], 4294967232 }
  0x4d   :  { %173 = vsyncpa [#allocation3], 1 }
  0x4e   :  { %174 = vsyncpa [#allocation4], 1 }
  0x4f   :  { %175 = vsyncpa [#allocation7], 1 }

</bundles_post_ra>
